<compile_context>
chip_gen: v7x
topology: tpu7x:2x2x1
jax: 0.10.0
libtpu: 0.0.40
codegen_flags: <defaults>
</compile_context>

<pallas_src>
import math

import jax
import jax.numpy as jnp
import numpy as np
from jax import lax
from jax.experimental import pallas as pl
from jax.experimental.pallas import tpu as pltpu

_LOG2E = math.log2(math.e)


# ---------------------------------------------------------------------------
# helpers
# ---------------------------------------------------------------------------
def _choose_tile(n, cap, align=16):
    """Largest divisor of n that is <= cap and `align`-aligned; else full dim."""
    if n <= cap:
        return n
    for t in range(cap, 0, -1):
        if n % t == 0 and t % align == 0:
            return t
    return n  # a full-extent block is always legal


# ---------------------------------------------------------------------------
# Tiled linear:  (N, Din) @ (Din, Dout) + (Dout,)   -- weight resident in VMEM
# ---------------------------------------------------------------------------
def _linear_kernel(x_ref, w_ref, b_ref, o_ref):
    acc = jnp.dot(x_ref[...], w_ref[...], preferred_element_type=jnp.float32)
    o_ref[...] = (acc + b_ref[...].astype(jnp.float32)).astype(o_ref.dtype)


def pallas_linear(x2d, w, b, *, tm_cap=512):
    """x2d: (N, Din) bf16, w: (Din, Dout) bf16, b: (Dout,) bf16 -> (N, Dout) bf16."""
    N, Din = x2d.shape
    Dout = w.shape[1]
    b2d = b.reshape(1, Dout)

    # Row tile: divisor of N (no padding), 16-aligned (bf16 packs 2 rows/sublane),
    # and prefer >= 2 grid steps so v7x's 2 TensorCores both get work.
    cap = min(tm_cap, N)
    if N >= 32:
        cap = min(cap, max(16, N // 2))
    tm = _choose_tile(N, cap, align=16)

    cost = pl.CostEstimate(
        flops=2 * N * Din * Dout,
        transcendentals=0,
        bytes_accessed=2 * (N * Din + Din * Dout + Dout + N * Dout),
    )
    return pl.pallas_call(
        _linear_kernel,
        out_shape=jax.ShapeDtypeStruct((N, Dout), x2d.dtype),
        grid=(N // tm,),
        in_specs=[
            pl.BlockSpec((tm, Din), lambda i: (i, 0)),
            # Full-extent weight/bias with constant index -> DMA'd once, stays in VMEM.
            pl.BlockSpec((Din, Dout), lambda i: (0, 0)),
            pl.BlockSpec((1, Dout), lambda i: (0, 0)),
        ],
        out_specs=pl.BlockSpec((tm, Dout), lambda i: (i, 0)),
        compiler_params=pltpu.CompilerParams(
            dimension_semantics=("parallel",),
        ),
        cost_estimate=cost,
    )(x2d, w, b2d)


# ---------------------------------------------------------------------------
# Flash attention, all heads batched per grid step.
#   q: (B, nh, Lq, hd)  (pre-scaled by log2(e)/sqrt(hd) via the qkv weights)
#   k,v: (B, nh, Lk, hd)
#   out: (B, Lq, nh*hd)  (token-major, lane-dense -> feeds proj directly)
# ---------------------------------------------------------------------------
def _flash_attn_kernel(q_ref, k_ref, v_ref, o_ref, m_sc, l_sc, acc_sc):
    ki = pl.program_id(2)
    nh, _, hd = acc_sc.shape

    @pl.when(ki == 0)
    def _():
        m_sc[...] = jnp.full_like(m_sc, -jnp.inf)
        l_sc[...] = jnp.zeros_like(l_sc)
        acc_sc[...] = jnp.zeros_like(acc_sc)

    q = q_ref[0]                                   # (nh, TQ, hd) bf16, pre-scaled
    k = k_ref[0]                                   # (nh, TK, hd) bf16
    # Batched QK^T contracting the trailing dim (no transpose of k).
    s = lax.dot_general(q, k, (((2,), (2,)), ((0,), (0,))),
                        preferred_element_type=jnp.float32)     # (nh, TQ, TK), log2 domain

    m_prev = m_sc[...]
    m_new = jnp.maximum(m_prev, jnp.max(s, axis=-1, keepdims=True))
    alpha = jnp.exp2(m_prev - m_new)
    p = jnp.exp2(s - m_new)                        # unnormalized probs
    l_sc[...] = alpha * l_sc[...] + jnp.sum(p, axis=-1, keepdims=True)
    pv = lax.dot_general(p.astype(v_ref.dtype), v_ref[0],
                         (((2,), (1,)), ((0,), (0,))),
                         preferred_element_type=jnp.float32)    # (nh, TQ, hd)
    acc_sc[...] = alpha * acc_sc[...] + pv
    m_sc[...] = m_new

    @pl.when(ki == pl.num_programs(2) - 1)
    def _():
        inv_l = pl.reciprocal(l_sc[...], approx=False)   # exact; once per q tile
        out = acc_sc[...] * inv_l                        # (nh, TQ, hd) f32
        # Lane-dense output tile (TQ, nh*hd): place each head at its lane slice.
        for h in range(nh):
            o_ref[0, :, h * hd:(h + 1) * hd] = out[h].astype(o_ref.dtype)


def pallas_flash_attention(q, k, v, *, tq_cap=128, tk_cap=1024):
    """q: (B, nh, Lq, hd), k/v: (B, nh, Lk, hd) -> (B, Lq, nh*hd)."""
    B, nh, Lq, hd = q.shape
    Lk = k.shape[2]
    dim_out = nh * hd

    TQ = _choose_tile(Lq, tq_cap, align=16)
    TK = _choose_tile(Lk, tk_cap, align=16)
    # TODO(synk): non-divisible Lq/Lk fall back to full-extent blocks; a proper masked
    # tail-tile path would be needed for arbitrary lengths with padding.

    cost = pl.CostEstimate(
        flops=4 * B * nh * Lq * Lk * hd,
        transcendentals=B * nh * Lq * Lk,
        bytes_accessed=2 * (q.size + k.size + v.size + B * Lq * dim_out),
    )
    return pl.pallas_call(
        _flash_attn_kernel,
        out_shape=jax.ShapeDtypeStruct((B, Lq, dim_out), q.dtype),
        grid=(B, Lq // TQ, Lk // TK),
        in_specs=[
            pl.BlockSpec((1, nh, TQ, hd), lambda b, qi, ki: (b, 0, qi, 0)),
            pl.BlockSpec((1, nh, TK, hd), lambda b, qi, ki: (b, 0, ki, 0)),
            pl.BlockSpec((1, nh, TK, hd), lambda b, qi, ki: (b, 0, ki, 0)),
        ],
        out_specs=pl.BlockSpec((1, TQ, dim_out), lambda b, qi, ki: (b, qi, 0)),
        scratch_shapes=[
            pltpu.VMEM((nh, TQ, 1), jnp.float32),    # running max m (base-2)
            pltpu.VMEM((nh, TQ, 1), jnp.float32),    # running denom l
            pltpu.VMEM((nh, TQ, hd), jnp.float32),   # output accumulator
        ],
        compiler_params=pltpu.CompilerParams(
            dimension_semantics=("parallel", "parallel", "arbitrary"),
        ),
        cost_estimate=cost,
    )(q, k, v)


# ---------------------------------------------------------------------------
# MultiScaleAttention forward (glue in plain JAX, hot paths in Pallas)
# ---------------------------------------------------------------------------
def max_pool_2x2(x_bhwc):
    # Equivalent of do_pool(x, nn.MaxPool2d(2, 2)) done directly in NHWC.
    return lax.reduce_window(
        x_bhwc, jnp.array(-jnp.inf, dtype=x_bhwc.dtype), lax.max,
        window_dimensions=(1, 2, 2, 1),
        window_strides=(1, 2, 2, 1),
        padding="VALID",
    )


def prepare_params(params, num_heads, dtype=jnp.bfloat16):
    """One-time prep: cast to bf16 and fold log2(e)/sqrt(head_dim) into the q columns."""
    dim_out = params["w_proj"].shape[1]
    head_dim = dim_out // num_heads
    q_scale = _LOG2E / math.sqrt(head_dim)
    col_scale = jnp.concatenate(
        [jnp.full((dim_out,), q_scale, jnp.float32),
         jnp.ones((2 * dim_out,), jnp.float32)])
    return {
        "w_qkv": (params["w_qkv"] * col_scale[None, :]).astype(dtype),
        "b_qkv": (params["b_qkv"] * col_scale).astype(dtype),
        "w_proj": params["w_proj"].astype(dtype),
        "b_proj": params["b_proj"].astype(dtype),
    }


def multi_scale_attention_forward(x, prep, num_heads, use_q_pool=False):
    """x: (B, H, W, dim)  ->  (B, H', W', dim_out), bf16."""
    B, H, W, dim = x.shape
    dim_out = prep["w_proj"].shape[1]
    assert dim_out % num_heads == 0, "dim_out must be divisible by num_heads"
    head_dim = dim_out // num_heads
    L = H * W

    x = x.astype(prep["w_qkv"].dtype)

    # qkv = self.qkv(x)  -- row-tiled Pallas matmul with the weight resident in VMEM.
    qkv = pallas_linear(x.reshape(B * L, dim), prep["w_qkv"], prep["b_qkv"])
    qkv = qkv.reshape(B, L, 3, num_heads, head_dim)
    q, k, v = qkv[:, :, 0], qkv[:, :, 1], qkv[:, :, 2]        # (B, L, nh, hd)

    Hq, Wq = H, W
    if use_q_pool:
        # scale folding commutes with max-pool (positive scalar).
        q = max_pool_2x2(q.reshape(B, H, W, num_heads * head_dim))
        Hq, Wq = q.shape[1], q.shape[2]
        q = q.reshape(B, Hq * Wq, num_heads, head_dim)
    Lq = Hq * Wq

    # TODO(synk): these head-major input transposes still go through XLA (bf16 now,
    # half the old traffic); writing the qkv linear's output head-major via its
    # out_spec would remove them entirely.
    q_t = q.transpose(0, 2, 1, 3)                             # (B, nh, Lq, hd)
    k_t = k.transpose(0, 2, 1, 3)                             # (B, nh, L,  hd)
    v_t = v.transpose(0, 2, 1, 3)

    # Attention output comes back token-major, lane-dense: (B, Lq, dim_out).
    o = pallas_flash_attention(q_t, k_t, v_t)

    out = pallas_linear(o.reshape(B * Lq, dim_out), prep["w_proj"], prep["b_proj"])
    return out.reshape(B, Hq, Wq, dim_out)


# Pure-JAX f32 reference for verification.
def reference_forward(x, params, num_heads, use_q_pool=False):
    B, H, W, dim = x.shape
    dim_out = params["w_proj"].shape[1]
    head_dim = dim_out // num_heads
    L = H * W
    qkv = x.reshape(B * L, dim) @ params["w_qkv"] + params["b_qkv"]
    qkv = qkv.reshape(B, L, 3, num_heads, head_dim)
    q, k, v = qkv[:, :, 0], qkv[:, :, 1], qkv[:, :, 2]
    Hq, Wq = H, W
    if use_q_pool:
        q = max_pool_2x2(q.reshape(B, H, W, num_heads * head_dim))
        Hq, Wq = q.shape[1], q.shape[2]
        q = q.reshape(B, Hq * Wq, num_heads, head_dim)
    q = q.transpose(0, 2, 1, 3)
    k = k.transpose(0, 2, 1, 3)
    v = v.transpose(0, 2, 1, 3)
    s = jnp.einsum("bhqd,bhkd->bhqk", q, k) / math.sqrt(head_dim)
    p = jax.nn.softmax(s, axis=-1)
    o = jnp.einsum("bhqk,bhkd->bhqd", p, v).transpose(0, 2, 1, 3)
    o = o.reshape(B * Hq * Wq, dim_out) @ params["w_proj"] + params["b_proj"]
    return o.reshape(B, Hq, Wq, dim_out)


# ---------------------------------------------------------------------------
# Deterministic parameter init (shapes from nn.Linear(dim, dim_out*3) etc.)
# ---------------------------------------------------------------------------
def init_params(key, dim, dim_out):
    k1, k2, k3, k4 = jax.random.split(key, 4)
    scale_qkv = 1.0 / math.sqrt(dim)
    scale_proj = 1.0 / math.sqrt(dim_out)
    return {
        # stored as (in, out) for x @ W; matches nn.Linear weight.T
        "w_qkv": jax.random.normal(k1, (dim, 3 * dim_out), jnp.float32) * scale_qkv,
        "b_qkv": jax.random.normal(k2, (3 * dim_out,), jnp.float32) * 0.01,
        "w_proj": jax.random.normal(k3, (dim_out, dim_out), jnp.float32) * scale_proj,
        "b_proj": jax.random.normal(k4, (dim_out,), jnp.float32) * 0.01,
    }


if __name__ == "__main__":
    key = jax.random.PRNGKey(0)
    kx, kp = jax.random.split(key)

    B, H, W = 2, 8, 8
    dim, dim_out, num_heads = 32, 64, 2

    x = jax.random.normal(kx, (B, H, W, dim), jnp.float32)
    params = init_params(kp, dim, dim_out)
    prep = prepare_params(params, num_heads)

    # Reference uses the same bf16-quantized params/input (f32 math) so the check
    # isolates kernel compute error; bf16 MXU/activations -> slightly loose tolerance.
    x_q = x.astype(jnp.bfloat16).astype(jnp.float32)
    params_q = jax.tree_util.tree_map(
        lambda a: a.astype(jnp.bfloat16).astype(jnp.float32), params)
    RTOL = ATOL = 3e-2

    # Case 1: q_pool = None (module default)
    out = multi_scale_attention_forward(x, prep, num_heads, use_q_pool=False)
    out = jax.block_until_ready(out)
    ref = reference_forward(x_q, params_q, num_heads, use_q_pool=False)
    assert out.shape == (B, H, W, dim_out)
    np.testing.assert_allclose(np.asarray(out.astype(jnp.float32)),
                               np.asarray(ref), rtol=RTOL, atol=ATOL)

    # Case 2: q_pool = MaxPool2d(kernel_size=2, stride=2)
    out_p = multi_scale_attention_forward(x, prep, num_heads, use_q_pool=True)
    out_p = jax.block_until_ready(out_p)
    ref_p = reference_forward(x_q, params_q, num_heads, use_q_pool=True)
    assert out_p.shape == (B, H // 2, W // 2, dim_out)
    np.testing.assert_allclose(np.asarray(out_p.astype(jnp.float32)),
                               np.asarray(ref_p), rtol=RTOL, atol=ATOL)

    print("KERNEL_OK")
</pallas_src>

<mosaic_0001>
module attributes {stable_mosaic.version = 11 : i64} {
  func.func @_linear_kernel(%arg0: i32, %arg1: memref<64x32xbf16, #tpu.memory_space<vmem>>, %arg2: memref<32x192xbf16, #tpu.memory_space<vmem>>, %arg3: memref<1x192xbf16, #tpu.memory_space<vmem>>, %arg4: memref<64x192xbf16, #tpu.memory_space<vmem>>) attributes {dimension_semantics = [#tpu.dimension_semantics<parallel>], iteration_bounds = array<i64: 2>, scalar_prefetch = 0 : i64, scratch_operands = 0 : i64, tpu.core_type = #tpu.core_type<tc>, window_params = [{transform_indices = @transform_0, window_bounds = array<i64: 64, 32>}, {pipeline_mode = #tpu.pipeline_mode<synchronous>, transform_indices = @transform_1, window_bounds = array<i64: 32, 192>}, {pipeline_mode = #tpu.pipeline_mode<synchronous>, transform_indices = @transform_2, window_bounds = array<i64: 1, 192>}, {transform_indices = @transform_3, window_bounds = array<i64: 64, 192>}]} {
    %c0 = arith.constant 0 : index
    %c0_0 = arith.constant 0 : index
    %0 = vector.load %arg1[%c0, %c0_0] : memref<64x32xbf16, #tpu.memory_space<vmem>>, vector<64x32xbf16>
    %c0_1 = arith.constant 0 : index
    %c0_2 = arith.constant 0 : index
    %1 = vector.load %arg2[%c0_1, %c0_2] : memref<32x192xbf16, #tpu.memory_space<vmem>>, vector<32x192xbf16>
    %cst = arith.constant dense<0.000000e+00> : vector<64x192xf32>
    %2 = tpu.matmul %0, %1, %cst {dimension_numbers = #tpu.dot_dimension_numbers<[1], [0], [0], [1], [0, 0, 1, 1], [], []>} : vector<64x32xbf16>, vector<32x192xbf16>, vector<64x192xf32> -> vector<64x192xf32>
    %c0_3 = arith.constant 0 : index
    %c0_4 = arith.constant 0 : index
    %3 = vector.load %arg3[%c0_3, %c0_4] : memref<1x192xbf16, #tpu.memory_space<vmem>>, vector<1x192xbf16>
    %4 = arith.extf %3 : vector<1x192xbf16> to vector<1x192xf32>
    %5 = vector.broadcast %4 : vector<1x192xf32> to vector<64x192xf32>
    %6 = arith.addf %2, %5 : vector<64x192xf32>
    %7 = arith.truncf %6 : vector<64x192xf32> to vector<64x192xbf16>
    %c0_5 = arith.constant 0 : index
    %c0_6 = arith.constant 0 : index
    %8 = vector.load %arg4[%c0_5, %c0_6] : memref<64x192xbf16, #tpu.memory_space<vmem>>, vector<64x192xbf16>
    tpu.vector_store %arg4[%c0_5, %c0_6], %7 {strides = array<i32>} : memref<64x192xbf16, #tpu.memory_space<vmem>>, vector<64x192xbf16>,
    return
  }
  func.func @transform_0(%arg0: i32) -> (i32, i32) {
    %c0_i32 = arith.constant 0 : i32
    %c0_i32_0 = arith.constant 0 : i32
    return %arg0, %c0_i32 : i32, i32
  }
  func.func @transform_1(%arg0: i32) -> (i32, i32) {
    %c0_i32 = arith.constant 0 : i32
    %c0_i32_0 = arith.constant 0 : i32
    %c0_i32_1 = arith.constant 0 : i32
    return %c0_i32, %c0_i32_0 : i32, i32
  }
  func.func @transform_2(%arg0: i32) -> (i32, i32) {
    %c0_i32 = arith.constant 0 : i32
    %c0_i32_0 = arith.constant 0 : i32
    %c0_i32_1 = arith.constant 0 : i32
    return %c0_i32, %c0_i32_0 : i32, i32
  }
  func.func @transform_3(%arg0: i32) -> (i32, i32) {
    %c0_i32 = arith.constant 0 : i32
    %c0_i32_0 = arith.constant 0 : i32
    return %arg0, %c0_i32 : i32, i32
  }
}

</mosaic_0001>

<bundles_post_ra>
// kernel: tpu_custom_call.1
= control target key start
LH: loop header
LB: loop body
LE: loop exit
PB: predicated region body
PF: predicated region fallthrough
CT: control target
= control target key end

     0   :  { %s546_s12 = smov 0   ;;  %s612_s0 = inlined_call_operand.vmem [shape: bf16[128,32], index: 0, kind: input, shape index: {}]   ;;  %s613_s1 = inlined_call_operand.vmem [shape: bf16[32,192], index: 1, kind: input, shape index: {}]   ;;  %s614_s2 = inlined_call_operand.vmem [shape: bf16[1,192], index: 2, kind: input, shape index: {}]   ;;  %s615_s3 = inlined_call_operand.vmem [shape: bf16[128,192], index: 3, kind: output, shape index: {}]  }
   0x1 LB: > { %s453_s13 = sadd.s32 4294967295, %s523_s12   ;;  %p457_p0 = scmp.ge.s32.totalorder %s523_s12, 1  ;;  %s523_s12 = sphi %s546_s12, %s13_s12  }
   0x2   : > { %p138_p1 = scmp.lt.s32.totalorder %s523_s12, 3 }
   0x4   : > { %p139_p2 = pnand %p457_p0, %p138_p1 }
   0x5   : > { %v507_v0 = vld [vmem:[%s613_s1 + $0x4] ss:$8 sps:$4 sm:$0xff] (!%p139_p2)   ;;  %s458_s16 = sshll.u32 (!%p139_p2), %s453_s13, 3  ;;  %v509_v1 = vld [vmem:[%s613_s1] ss:$8 sps:$4 sm:$0xff] (!%p139_p2)   ;;  %v525_v2 = vmov (!%p139_p2), 0   ;;  %v192_v9 = vlaneseq (!%p139_p2) }
   0x6   : > { %142 = sbr.rel (%p139_p2) target bundleno = 245 (0xf5), region = 32  ;;  %295 = vmatprep.mubr.bf16.mxu0 (!%p139_p2), %v525_v2  ;;  %315 = vmatprep.mubr.bf16.mxu1 (!%p139_p2), %v525_v2  ;;  %p164_p3 = scmp.lt.s32.totalorder (!%p139_p2), %s458_s16, 15  ;;  %v510_v3 = vld [vmem:[%s613_s1 + $0x14] ss:$8 sps:$4 sm:$0xff] (!%p139_p2)   ;;  %v512_v4 = vld [vmem:[%s613_s1 + $0x10] ss:$8 sps:$4 sm:$0xff] (!%p139_p2)  }
   0x7   : > { %263 = vmatprep.subr.bf16.mxu0 (!%p139_p2), %v507_v0  ;;  %494 = vmatprep.subr.bf16.mxu1 (!%p139_p2), %v507_v0  ;;  %vm250_vm0 = vcmask (!%p139_p2), 261120   ;;  %v193_v10 = vshrl.u32 (!%p139_p2), %v192_v9, 7  ;;  %v189_v11 = vld [vmem:[%s614_s2] sm:$0x3] (!%p139_p2)  ;;  %vm384_vm1 = vcmask (!%p139_p2), 1043456   ;;  %vm385_vm2 = vcmask (!%p139_p2), 523268  }
   0x8   : > { %264 = vmatpush1.bf16.msra.mxu0 (!%p139_p2), %v509_v1  ;;  %496 = vmatpush1.bf16.msra.mxu1 (!%p139_p2), %v509_v1  ;;  %v190_v12 = vunpack.c.l.bf16 (!%p139_p2), %v189_v11  ;;  %vm581_vm3 = vmor (!%p139_p2), %vm385_vm2, %vm384_vm1 }
   0x9   : > { %265 = vmatprep.subr.bf16.mxu0 (!%p139_p2), %v510_v3  ;;  %495 = vmatprep.subr.bf16.mxu1 (!%p139_p2), %v510_v3  ;;  %v194_v13 = vsub.s32 (!%p139_p2), 0, %v193_v10  ;;  %v198_v14 = vsub.s32 (!%p139_p2), 2, %v193_v10 }
   0xb   : > { %v195_v15 = vrot.slane (!%p139_p2), %v190_v12, %v194_v13  ;;  %v199_v16 = vrot.slane (!%p139_p2), %v190_v12, %v198_v14 }
   0xc   : > { %266 = vmatpush1.bf16.msra.mxu0 (!%p139_p2), %v512_v4  ;;  %497 = vmatpush1.bf16.msra.mxu1 (!%p139_p2), %v512_v4 }
   0xd   : > { %s619_s16 = smov (!%p164_p3, %s458_s16), 15  ;;  %v205_v17 = vrot.slane %v195_v15, %v194_v13  ;;  %v209_v18 = vrot.slane %v199_v16, %v194_v13 }
   0xe   : > { %s459_s23 = sshll.u32 %s619_s16, 2  ;;  %s485_s29 = sshll.u32 %s619_s16, 3 }
   0xf   : > { %s167_s26 = scalar_lea.vmem %s612_s0, %s459_s23  ;;  %s579_s5 = scalar_lea.vmem %s615_s3, %s485_s29 }
  0x10   : > { %v513_v5 = vld [vmem:[%s167_s26] sm:$0xff]   ;;  %v514_v6 = vld [vmem:[%s167_s26 + $0x10] sm:$0xff]   ;;  %v515_v7 = vld [vmem:[%s167_s26 + $0x8] sm:$0xff]  }
  0x11   : > { %471 = vmatmul.mubr.msk.bf16.vlgmr.msra.gmra.mrb[0].mxu0 %vm250_vm0, %v513_v5  ;;  %473 = vmatmul.mubr.msk.bf16.vlgmr.msra.gmra.mrb[0].mxu1 %vm250_vm0, %v514_v6  ;;  %v516_v8 = vld [vmem:[%s167_s26 + $0x18] sm:$0xff]  }
  0x12   : > { %305 = vmatprep.mubr.bf16.mxu0 %v525_v2  ;;  %325 = vmatprep.mubr.bf16.mxu1 %v525_v2 }
  0x19   : > { %472 = vmatmul.mubr.msk.bf16.gmra.mrb[4].mxu0 %vm250_vm0, %v515_v7  ;;  %474 = vmatmul.mubr.msk.bf16.gmra.mrb[4].mxu1 %vm250_vm0, %v516_v8 }
  0xe4   : > { %v297_v19 = vpop.f32.mrb[0].mxu0  ;;  %v317_v20 = vpop.f32.mrb[0].mxu1 }
  0xe5   : > { %v298_v21 = vadd.f32 %v297_v19, %v205_v17  ;;  %v318_v22 = vadd.f32 %v317_v20, %v205_v17  ;;  %v299_v23 = vpop.f32.mrb[1].mxu0  ;;  %v319_v24 = vpop.f32.mrb[1].mxu1 }
  0xe6   : > { %v300_v25 = vadd.f32 %v299_v23, %v209_v18  ;;  %v320_v26 = vadd.f32 %v319_v24, %v209_v18  ;;  %v301_v27 = vpop.f32.mrb[2].mxu0  ;;  %v321_v28 = vpop.f32.mrb[2].mxu1 }
  0xe7   : > { %v302_v30 = vadd.f32 %v301_v27, %v205_v17  ;;  %v322_v31 = vadd.f32 %v321_v28, %v205_v17  ;;  %v303_v32 = vpop.f32.mrb[3].mxu0  ;;  %v323_v33 = vpop.f32.mrb[3].mxu1 }
  0xe8   : > { %v486_v34 = vpack.c.bf16 %v300_v25, %v298_v21  ;;  %v490_v35 = vpack.c.bf16 %v320_v26, %v318_v22  ;;  %v304_v36 = vadd.f32 %v303_v32, %v209_v18  ;;  %v324_v37 = vadd.f32 %v323_v33, %v209_v18 }
  0xea   : > { %387 = vst.msk [vmem:[%s579_s5] sm:$0xff] %vm581_vm3, %v486_v34  ;;  %391 = vst.msk [vmem:[%s579_s5 + $0x20] sm:$0xff] %vm581_vm3, %v490_v35  ;;  %v487_v38 = vpack.c.bf16 %v304_v36, %v302_v30  ;;  %v491_v39 = vpack.c.bf16 %v324_v37, %v322_v31 }
  0xec   : > { %388 = vst.msk [vmem:[%s579_s5 + $0x8] sm:$0xff] %vm581_vm3, %v487_v38  ;;  %392 = vst.msk [vmem:[%s579_s5 + $0x28] sm:$0xff] %vm581_vm3, %v491_v39  ;;  %v307_v40 = vpop.f32.mrb[4].mxu0  ;;  %v327_v41 = vpop.f32.mrb[4].mxu1 }
  0xed   : > { %v308_v42 = vadd.f32 %v307_v40, %v205_v17  ;;  %v328_v43 = vadd.f32 %v327_v41, %v205_v17  ;;  %v309_v44 = vpop.f32.mrb[5].mxu0  ;;  %v329_v45 = vpop.f32.mrb[5].mxu1 }
  0xee   : > { %v310_v46 = vadd.f32 %v309_v44, %v209_v18  ;;  %v330_v47 = vadd.f32 %v329_v45, %v209_v18  ;;  %v311_v48 = vpop.f32.mrb[6].mxu0  ;;  %v331_v49 = vpop.f32.mrb[6].mxu1 }
  0xef   : > { %v312_v50 = vadd.f32 %v311_v48, %v205_v17  ;;  %v332_v51 = vadd.f32 %v331_v49, %v205_v17  ;;  %v313_v52 = vpop.f32.mrb[7].mxu0  ;;  %v333_v53 = vpop.f32.mrb[7].mxu1 }
  0xf0   : > { %v488_v54 = vpack.c.bf16 %v310_v46, %v308_v42  ;;  %v492_v55 = vpack.c.bf16 %v330_v47, %v328_v43  ;;  %v314_v56 = vadd.f32 %v313_v52, %v209_v18  ;;  %v334_v57 = vadd.f32 %v333_v53, %v209_v18 }
  0xf2   : > { %389 = vst.msk [vmem:[%s579_s5 + $0x10] sm:$0xff] %vm581_vm3, %v488_v54  ;;  %393 = vst.msk [vmem:[%s579_s5 + $0x30] sm:$0xff] %vm581_vm3, %v492_v55  ;;  %v489_v58 = vpack.c.bf16 %v314_v56, %v312_v50  ;;  %v493_v59 = vpack.c.bf16 %v334_v57, %v332_v51 }
  0xf4   : > { %390 = vst.msk [vmem:[%s579_s5 + $0x18] sm:$0xff] %vm581_vm3, %v489_v58  ;;  %394 = vst.msk [vmem:[%s579_s5 + $0x38] sm:$0xff] %vm581_vm3, %v493_v59 }
  0xf5 PF: > { %s13_s12 = sadd.s32 1, %s523_s12  }
  0xf6   : > { %p10_p4 = scmp.ge.s32.totalorder %s13_s12, 4  }
  0xf8   :  { %12 = sbr.rel (!%p10_p4) target bundleno = 1 (0x1), region = 62 }

</bundles_post_ra>
